<compile_context>
chip_gen: v7x
topology: tpu7x:2x2x1
jax: 0.10.0
libtpu: 0.0.40
codegen_flags: <defaults>
</compile_context>

<pallas_src>
import math

import jax
import jax.numpy as jnp
from jax.experimental import pallas as pl
from jax.experimental.pallas import tpu as pltpu


def gcn_fused_kernel(adj_ref, x_ref, w_ref, b_ref, o_ref):
    """Whole GCN layer in one straight-line body (no grid).

    adj_ref: (B*N, B*N) VMEM  -- block-diagonal adjacency (block_diag of adj, B times)
    x_ref:   (B*N, C*W) VMEM  -- x relayouted so rows = (b, node), cols = (c, w)
    w_ref:   (C*W, O*W) VMEM  -- kron(weight^T, I_W): channel mix as a matmul
    b_ref:   (1, O*W)   VMEM  -- bias repeated over w
    o_ref:   (B*N, O*W) VMEM  -- output, rows = (b, node), cols = (o, w)
    """
    # Stage 1: node mixing, one lane-dense MXU matmul, f32 accumulation.
    z = jnp.dot(
        adj_ref[...], x_ref[...],
        preferred_element_type=jnp.float32,
        precision=jax.lax.Precision.HIGHEST,
    )
    # Stage 2: channel mixing + bias, second MXU matmul; result stays in VMEM,
    # stored with full-lane (128-wide) unmasked vst.
    out = jnp.dot(
        z, w_ref[...],
        preferred_element_type=jnp.float32,
        precision=jax.lax.Precision.HIGHEST,
    )
    o_ref[...] = (out + b_ref[...]).astype(o_ref.dtype)


def graph_convolution(x, adj, weight, bias):
    """x: (B, C, N, W) NCHW, adj: (N, N), weight: (O, C), bias: (O,) -> (B, O, N, W)."""
    B, C, N, W = x.shape
    O = weight.shape[0]
    BN, CW, OW = B * N, C * W, O * W

    # ---- Host-side structural prep (tiny, layout only; all contractions are in-kernel).
    # Block-diagonal adjacency so stage 1 is a single 2-D matmul over all batches.
    adj_blk = jnp.kron(jnp.eye(B, dtype=adj.dtype), adj)              # (B*N, B*N)
    # x relayout: rows (b, node), cols (c, w)  -> lane-dense RHS for stage 1.
    x2 = jnp.transpose(x, (0, 2, 1, 3)).reshape(BN, CW)               # (B*N, C*W)
    # Channel mix as a matmul on the lanes: M[(c,w'),(o,w)] = W[o,c] * delta(w',w).
    w2 = jnp.kron(weight.T, jnp.eye(W, dtype=weight.dtype))           # (C*W, O*W)
    # Bias expanded over w so it is a single (1, O*W) lane-dense broadcast add.
    b2 = jnp.repeat(bias, W).reshape(1, OW)                           # (1, O*W)

    flops = 2 * BN * BN * CW + 2 * BN * CW * OW
    bytes_accessed = 4 * (BN * BN + BN * CW + CW * OW + OW + BN * OW)

    out2 = pl.pallas_call(
        gcn_fused_kernel,
        out_shape=jax.ShapeDtypeStruct((BN, OW), x.dtype),
        in_specs=[
            pl.BlockSpec((BN, BN), lambda: (0, 0)),   # block-diag adjacency
            pl.BlockSpec((BN, CW), lambda: (0, 0)),   # relayouted x
            pl.BlockSpec((CW, OW), lambda: (0, 0)),   # expanded weight
            pl.BlockSpec((1, OW), lambda: (0, 0)),    # expanded bias
        ],
        out_specs=pl.BlockSpec((BN, OW), lambda: (0, 0)),
        cost_estimate=pl.CostEstimate(
            flops=flops, transcendentals=0, bytes_accessed=bytes_accessed),
    )(adj_blk, x2, w2, b2)

    # Back to NCHW: tiny (16 KiB) contiguous reshape + transpose in XLA.
    return jnp.transpose(out2.reshape(B, N, O, W), (0, 2, 1, 3))      # (B, O, N, W)


def reference(x, adj, weight, bias):
    # Pure-JAX reference mirroring the PyTorch forward exactly (f32 precision).
    hp = jax.lax.Precision.HIGHEST
    input_x = jnp.einsum("nm,bcmw->bcnw", adj, x, precision=hp)       # (B, C, N, W)
    h = jnp.transpose(input_x, (0, 2, 3, 1))                          # (B, N, W, C)
    out = jnp.einsum("bnwc,oc->bnwo", h, weight, precision=hp) + bias # (B, N, W, O)
    return jnp.transpose(out, (0, 3, 1, 2))                           # (B, O, N, W)


if __name__ == "__main__":
    # Sizes implied by the module: in_features = C, out_features = O.
    B, C, N, W = 2, 4, 16, 16
    O = 8

    key = jax.random.PRNGKey(0)
    kx, ka, kw, kb = jax.random.split(key, 4)

    x = jax.random.normal(kx, (B, C, N, W), dtype=jnp.float32)
    adj = jax.random.uniform(ka, (N, N), dtype=jnp.float32)

    # Deterministic nn.Linear-style init: U(-1/sqrt(fan_in), 1/sqrt(fan_in))
    bound = 1.0 / math.sqrt(C)
    weight = jax.random.uniform(kw, (O, C), minval=-bound, maxval=bound,
                                dtype=jnp.float32)
    bias = jax.random.uniform(kb, (O,), minval=-bound, maxval=bound,
                              dtype=jnp.float32)

    out = graph_convolution(x, adj, weight, bias)
    out = jax.block_until_ready(out)

    ref = reference(x, adj, weight, bias)
    assert out.shape == (B, O, N, W), out.shape
    assert jnp.allclose(out, ref, atol=1e-4, rtol=1e-4), "mismatch vs reference"

    print("KERNEL_OK")
</pallas_src>

<mosaic_0001>
module attributes {stable_mosaic.version = 11 : i64} {
  func.func @gcn_fused_kernel(%arg0: memref<32x32xf32, #tpu.memory_space<vmem>>, %arg1: memref<32x64xf32, #tpu.memory_space<vmem>>, %arg2: memref<64x128xf32, #tpu.memory_space<vmem>>, %arg3: memref<1x128xf32, #tpu.memory_space<vmem>>, %arg4: memref<32x128xf32, #tpu.memory_space<vmem>>) attributes {dimension_semantics = [], scalar_prefetch = 0 : i64, scratch_operands = 0 : i64, tpu.core_type = #tpu.core_type<tc>} {
    %c0 = arith.constant 0 : index
    %c0_0 = arith.constant 0 : index
    %0 = vector.load %arg0[%c0, %c0_0] : memref<32x32xf32, #tpu.memory_space<vmem>>, vector<32x32xf32>
    %c0_1 = arith.constant 0 : index
    %c0_2 = arith.constant 0 : index
    %1 = vector.load %arg1[%c0_1, %c0_2] : memref<32x64xf32, #tpu.memory_space<vmem>>, vector<32x64xf32>
    %cst = arith.constant dense<0.000000e+00> : vector<32x64xf32>
    %2 = tpu.matmul %0, %1, %cst {dimension_numbers = #tpu.dot_dimension_numbers<[1], [0], [0], [1], [0, 0, 1, 1], [], []>, precision = #tpu.contract_precision<fp32>} : vector<32x32xf32>, vector<32x64xf32>, vector<32x64xf32> -> vector<32x64xf32>
    %c0_3 = arith.constant 0 : index
    %c0_4 = arith.constant 0 : index
    %3 = vector.load %arg2[%c0_3, %c0_4] : memref<64x128xf32, #tpu.memory_space<vmem>>, vector<64x128xf32>
    %cst_5 = arith.constant dense<0.000000e+00> : vector<32x128xf32>
    %4 = tpu.matmul %2, %3, %cst_5 {dimension_numbers = #tpu.dot_dimension_numbers<[1], [0], [0], [1], [0, 0, 1, 1], [], []>, precision = #tpu.contract_precision<fp32>} : vector<32x64xf32>, vector<64x128xf32>, vector<32x128xf32> -> vector<32x128xf32>
    %c0_6 = arith.constant 0 : index
    %c0_7 = arith.constant 0 : index
    %5 = vector.load %arg3[%c0_6, %c0_7] : memref<1x128xf32, #tpu.memory_space<vmem>>, vector<1x128xf32>
    %6 = vector.broadcast %5 : vector<1x128xf32> to vector<32x128xf32>
    %7 = arith.addf %4, %6 : vector<32x128xf32>
    %c0_8 = arith.constant 0 : index
    %c0_9 = arith.constant 0 : index
    %8 = vector.load %arg4[%c0_8, %c0_9] : memref<32x128xf32, #tpu.memory_space<vmem>>, vector<32x128xf32>
    tpu.vector_store %arg4[%c0_8, %c0_9], %7 {strides = array<i32>} : memref<32x128xf32, #tpu.memory_space<vmem>>, vector<32x128xf32>,
    return
  }
}

</mosaic_0001>

<bundles_post_ra>
// kernel: tpu_custom_call.1
= control target key start
LH: loop header
LB: loop body
LE: loop exit
PB: predicated region body
PF: predicated region fallthrough
CT: control target
= control target key end

     0   :  { %9 = vsyncpa [#allocation3], 0  ;;  %s2439_s0 = inlined_call_operand.hbm [shape: f32[32,32], index: 0, kind: input, shape index: {}]   ;;  %s2440_s1 = inlined_call_operand.hbm [shape: f32[32,64], index: 1, kind: input, shape index: {}]   ;;  %s2441_s2 = inlined_call_operand.hbm [shape: f32[64,128], index: 2, kind: input, shape index: {}]   ;;  %s2442_s3 = inlined_call_operand.vmem [shape: f32[1,128], index: 3, kind: input, shape index: {}]   ;;  %s2443_s4 = inlined_call_operand.hbm [shape: f32[32,128], index: 4, kind: output, shape index: {}]  }
   0x1   :  { %10 = vsyncpa [#allocation6], 0 }
   0x2   :  { %11 = vsyncpa [#allocation4], 0  ;;  %s2043_s15 = smov [#allocation5]   ;;  %s2044_s17 = smov [#allocation2]  }
   0x3   :  { %s29_s16 = sshll.u32 %s2043_s15, 4  ;;  %s17_s18 = sshll.u32 %s2044_s17, 4  ;;  %s30_s16 = int_to_ptr.vmem [resolvable:$true] %s29_s16  ;;  %s2074_s18 = int_to_ptr.vmem [resolvable:$true] %s17_s18 }
   0x4   :  { %s1949_s21 = scalar_lea.hbm %s2440_s1, 512 }
   0x5   :  { %p1950_p0 = scmp.ne.s32.totalorder %s2440_s1, %s1949_s21  ;;  %p1953_p1 = scmp.lt.u32.totalorder %s1949_s21, %s2440_s1 }
   0x7   :  { %p1955_p2 = pnand %p1953_p1, %p1950_p0 }
   0x9   :  { %1958 = shalt.err (!%p1955_p2)
}
   0xa   :  { %s1959_s26 = scalar_lea.vmem %s30_s16, 512  ;;  %p1964_p4 = scmp.lt.s32.totalorder %s30_s16, %s30_s16 }
   0xb   :  { %p1960_p3 = scmp.ne.s32.totalorder %s30_s16, %s1959_s26  ;;  %p1965_p5 = scmp.lt.s32.totalorder %s1959_s26, %s1959_s26 }
   0xd   :  { %p1966_p6 = por %p1965_p5, %p1964_p4 }
   0xf   :  { %p1967_p7 = pnand %p1966_p6, %p1960_p3 }
  0x11   :  { %1970 = shalt.err (!%p1967_p7)
}
  0x12   :  { %s2045_s27 = smov 128   ;;  %s2046_s28 = smov 8  }
  0x13   :  { %35 = dma.hbm_to_vmem [thread:$0]  %s2440_s1, 512, %s30_s16, [#allocation6], %s2045_s27, %s2045_s27, %s2046_s28  }
  0x14   :  { %s1971_s7 = scalar_lea.hbm %s2439_s0, 512 }
  0x15   :  { %p1972_p8 = scmp.ne.s32.totalorder %s2439_s0, %s1971_s7  ;;  %p1975_p9 = scmp.lt.u32.totalorder %s1971_s7, %s2439_s0 }
  0x17   :  { %p1977_p10 = pnand %p1975_p9, %p1972_p8 }
  0x19   :  { %1980 = shalt.err (!%p1977_p10)
}
  0x1a   :  { %s1981_s12 = scalar_lea.vmem %s2074_s18, 512  ;;  %p1986_p12 = scmp.lt.s32.totalorder %s2074_s18, %s2074_s18 }
  0x1b   :  { %p1982_p11 = scmp.ne.s32.totalorder %s2074_s18, %s1981_s12  ;;  %p1987_p13 = scmp.lt.s32.totalorder %s1981_s12, %s1981_s12 }
  0x1d   :  { %p1988_p0 = por %p1987_p13, %p1986_p12 }
  0x1f   :  { %p1989_p1 = pnand %p1988_p0, %p1982_p11 }
  0x21   :  { %1992 = shalt.err (!%p1989_p1)
}
  0x22   :  { %23 = dma.hbm_to_vmem [thread:$0]  %s2439_s0, 512, %s2074_s18, [#allocation3], %s2045_s27, %s2045_s27, %s2046_s28  }
  0x23   :  { %s2047_s14 = smov [#allocation7]   ;;  %s1993_s19 = scalar_lea.hbm %s2441_s2, 1024 }
  0x24   :  { %s41_s15 = sshll.u32 %s2047_s14, 4  ;;  %p1994_p2 = scmp.ne.s32.totalorder %s2441_s2, %s1993_s19  ;;  %s42_s15 = int_to_ptr.vmem [resolvable:$true] %s41_s15 }
  0x25   :  { %p1997_p3 = scmp.lt.u32.totalorder %s1993_s19, %s2441_s2 }
  0x27   :  { %p1999_p4 = pnand %p1997_p3, %p1994_p2 }
  0x29   :  { %2002 = shalt.err (!%p1999_p4)
}
  0x2a   :  { %s2003_s24 = scalar_lea.vmem %s42_s15, 1024  ;;  %p2008_p6 = scmp.lt.s32.totalorder %s42_s15, %s42_s15 }
  0x2b   :  { %p2004_p5 = scmp.ne.s32.totalorder %s42_s15, %s2003_s24  ;;  %p2009_p7 = scmp.lt.s32.totalorder %s2003_s24, %s2003_s24 }
  0x2d   :  { %p2010_p8 = por %p2009_p7, %p2008_p6 }
  0x2f   :  { %p2011_p9 = pnand %p2010_p8, %p2004_p5 }
  0x31   :  { %2014 = shalt.err (!%p2011_p9)
}
  0x32   :  { %47 = dma.hbm_to_vmem [thread:$0]  %s2441_s2, 1024, %s42_s15, [#allocation6], %s2045_s27, %s2045_s27, %s2046_s28  }
  0x33   :  { %2037 = dma.done.wait [#allocation3], 512  }
  0x34   :  { %2038 = vsyncadd [#allocation3], 4294966784 }
  0x35   :  { %2039 = dma.done.wait [#allocation6], 1536  }
  0x36   :  { %2040 = vsyncadd [#allocation6], 4294965760  ;;  %vm67_vm0 = vcmask 261120   ;;  %v63_v0 = vld [vmem:[#allocation5] sm:$0xff]  ;;  %v64_v1 = vld [vmem:[#allocation5 + $0x8] sm:$0xff]  ;;  %vm709_vm1 = vcmask 523264  }
  0x37   :  { %v65_v2 = vld [vmem:[#allocation5 + $0x10] sm:$0xff]  ;;  %v81_v3 = vand.u32 4294901760, %v63_v0  ;;  %v84_v4 = vand.u32 4294901760, %v64_v1  ;;  %v66_v5 = vld [vmem:[#allocation5 + $0x18] sm:$0xff]  ;;  %v59_v7 = vld [vmem:[#allocation2] sm:$0xff]  ;;  %s2048_s26 = smov [#allocation8]  }
  0x38   :  { %v87_v6 = vand.u32 4294901760, %v65_v2  ;;  %v60_v8 = vld [vmem:[#allocation2 + $0x8] sm:$0xff]  ;;  %v90_v9 = vand.u32 4294901760, %v66_v5  ;;  %v69_v10 = vsel %vm67_vm0, %v59_v7, 0  ;;  %v61_v12 = vld [vmem:[#allocation2 + $0x10] sm:$0xff]  ;;  %v62_v13 = vld [vmem:[#allocation2 + $0x18] sm:$0xff] }
  0x39   :  { %v72_v11 = vsel %vm67_vm0, %v60_v8, 0  ;;  %v2128_v14 = vpack.c.bf16 %v84_v4, %v81_v3  ;;  %v2130_v15 = vand.u32 4294901760, %v69_v10  ;;  %v2134_v17 = vsub.f32 %v63_v0, %v81_v3  ;;  %v2195_v49 = vld [vmem:[#allocation7] sm:$0xff]  ;;  %v2197_v50 = vld [vmem:[#allocation7 + $0x8] sm:$0xff]  ;;  %v2199_v51 = vld [vmem:[#allocation7 + $0x10] sm:$0xff]  ;;  %s1397_s29 = sshll.u32 %s2048_s26, 4  ;;  %s1398_s29 = int_to_ptr.vmem [resolvable:$true] %s1397_s29 }
  0x3a   :  { %v2132_v16 = vand.u32 4294901760, %v72_v11  ;;  %v2136_v18 = vpack.c.bf16 %v90_v9, %v87_v6  ;;  %v2138_v19 = vsub.f32 %v64_v1, %v84_v4  ;;  %v75_v20 = vsel %vm67_vm0, %v61_v12, 0  ;;  %v2204_v56 = vld [vmem:[#allocation7 + $0x18] sm:$0xff]  ;;  %v2206_v57 = vld [vmem:[#allocation7 + $0x20] sm:$0xff]  ;;  %v2208_v58 = vld [vmem:[#allocation7 + $0x28] sm:$0xff]  ;;  %p2020_p11 = scmp.lt.s32.totalorder %s1398_s29, %s1398_s29 }
  0x3b   :  { %v78_v21 = vsel %vm67_vm0, %v62_v13, 0  ;;  %1748 = vmatprep.subr.bf16.mxu0 %v2128_v14  ;;  %v2144_v22 = vsub.f32 %v69_v10, %v2130_v15  ;;  %v192_v24 = vand.u32 4294901760, %v2134_v17  ;;  %v2150_v25 = vand.u32 4294901760, %v75_v20 }
  0x3c   :  { %v2147_v23 = vsub.f32 %v72_v11, %v2132_v16  ;;  %1750 = vmatpush3.bf16.msra.mxu0 %v2128_v14  ;;  %v199_v26 = vand.u32 4294901760, %v2138_v19  ;;  %v2154_v27 = vand.u32 4294901760, %v78_v21  ;;  %v2156_v28 = vsub.f32 %v65_v2, %v87_v6 }
  0x3d   :  { %v2158_v29 = vsub.f32 %v66_v5, %v90_v9  ;;  %1752 = vmatprep.subr.bf16.mxu0 %v2136_v18  ;;  %v151_v30 = vand.u32 4294901760, %v2144_v22  ;;  %v193_v32 = vsub.f32 %v2134_v17, %v192_v24  ;;  %v2167_v33 = vsub.f32 %v75_v20, %v2150_v25 }
  0x3e   :  { %v161_v31 = vand.u32 4294901760, %v2147_v23  ;;  %v200_v34 = vsub.f32 %v2138_v19, %v199_v26  ;;  %v2173_v35 = vsub.f32 %v78_v21, %v2154_v27  ;;  %v206_v36 = vand.u32 4294901760, %v2156_v28 }
  0x3f   :  { %v213_v37 = vand.u32 4294901760, %v2158_v29  ;;  %v152_v38 = vsub.f32 %v2144_v22, %v151_v30  ;;  %v194_v40 = vand.u32 4294901760, %v193_v32  ;;  %v171_v41 = vand.u32 4294901760, %v2167_v33 }
  0x40   :  { %v162_v39 = vsub.f32 %v2147_v23, %v161_v31  ;;  %1754 = vmatpush3.bf16.msra.mxu0 %v2136_v18  ;;  %v201_v42 = vand.u32 4294901760, %v200_v34  ;;  %v181_v43 = vand.u32 4294901760, %v2173_v35  ;;  %v207_v44 = vsub.f32 %v2156_v28, %v206_v36 }
  0x41   :  { %v214_v45 = vsub.f32 %v2158_v29, %v213_v37  ;;  %v153_v46 = vand.u32 4294901760, %v152_v38  ;;  %v172_v48 = vsub.f32 %v2167_v33, %v171_v41  ;;  %v723_v62 = vand.u32 4294901760, %v2195_v49 }
  0x42   :  { %v163_v47 = vand.u32 4294901760, %v162_v39  ;;  %v1755_v52 = vpack.c.bf16 %v201_v42, %v194_v40  ;;  %v182_v53 = vsub.f32 %v2173_v35, %v181_v43  ;;  %v208_v54 = vand.u32 4294901760, %v207_v44 }
  0x43   :  { %v215_v55 = vand.u32 4294901760, %v214_v45  ;;  %1539 = vmatprep.mubr.f32.mxu0 %v153_v46  ;;  %v173_v59 = vand.u32 4294901760, %v172_v48  ;;  %v726_v63 = vand.u32 4294901760, %v2197_v50  ;;  %v729_v0 = vand.u32 4294901760, %v2199_v51 }
  0x44   :  { %1540 = vmatmul.mubr.f32.vlgmr.msra.gmra.mrb[0].mxu0 %v163_v47  ;;  %1756 = vmatprep.subr.bf16.mxu0 %v1755_v52  ;;  %v183_v60 = vand.u32 4294901760, %v182_v53  ;;  %v732_v1 = vand.u32 4294901760, %v2204_v56  ;;  %v735_v2 = vand.u32 4294901760, %v2206_v57  ;;  %v738_v3 = vand.u32 4294901760, %v2208_v58 }
  0x45   :  { %v1759_v61 = vpack.c.bf16 %v215_v55, %v208_v54  ;;  %1758 = vmatpush3.bf16.msra.mxu0 %v1755_v52  ;;  %1542 = vmatprep.mubr.f32.mxu0 %v173_v59  ;;  %v1763_v4 = vpack.c.bf16 %v2138_v19, %v2134_v17  ;;  %v2221_v5 = vsub.f32 %v2195_v49, %v723_v62 }
  0x46   :  { %v2226_v6 = vsub.f32 %v2197_v50, %v726_v63  ;;  %v2231_v7 = vsub.f32 %v2199_v51, %v729_v0  ;;  %v2236_v8 = vsub.f32 %v2204_v56, %v732_v1  ;;  %v2243_v11 = vsub.f32 %v2206_v57, %v735_v2 }
  0x47   :  { %1760 = vmatprep.subr.bf16.mxu0 %v1759_v61  ;;  %v838_v9 = vand.u32 4294901760, %v2221_v5  ;;  %v2248_v12 = vsub.f32 %v2208_v58, %v738_v3  ;;  %v1767_v13 = vpack.c.bf16 %v2158_v29, %v2156_v28  ;;  %v2312_v17 = vpack.c.bf16 %v726_v63, %v723_v62 }
  0x48   :  { %1543 = vmatmul.mubr.f32.gmra.mrb[2].mxu0 %v183_v60  ;;  %v845_v10 = vand.u32 4294901760, %v2226_v6  ;;  %v852_v20 = vand.u32 4294901760, %v2231_v7  ;;  %v859_v21 = vand.u32 4294901760, %v2236_v8  ;;  %v866_v38 = vand.u32 4294901760, %v2243_v11 }
  0x49   :  { %1762 = vmatpush3.bf16.msra.mxu0 %v1759_v61  ;;  %1553 = vmatprep.mubr.f32.mxu0 %v2130_v15  ;;  %v839_v32 = vsub.f32 %v2221_v5, %v838_v9  ;;  %v873_v39 = vand.u32 4294901760, %v2248_v12  ;;  %v1779_v61 = vpack.c.bf16 %v199_v26, %v192_v24  ;;  %v1831_v62 = vpack.c.bf16 %v2236_v8, %v2231_v7 }
  0x4a   :  { %1764 = vmatprep.subr.bf16.mxu0 %v1763_v4  ;;  %v846_v34 = vsub.f32 %v2226_v6, %v845_v10  ;;  %v853_v40 = vsub.f32 %v2231_v7, %v852_v20  ;;  %v860_v42 = vsub.f32 %v2236_v8, %v859_v21  ;;  %v867_v46 = vsub.f32 %v2243_v11, %v866_v38 }
  0x4b   :  { %v840_v44 = vand.u32 4294901760, %v839_v32  ;;  %v874_v47 = vsub.f32 %v2248_v12, %v873_v39 }
  0x4c   :  { %1554 = vmatmul.mubr.f32.vlgmr.msra.gmra.mrb[0].mxu0 %v2132_v16  ;;  %v847_v45 = vand.u32 4294901760, %v846_v34  ;;  %v854_v48 = vand.u32 4294901760, %v853_v40  ;;  %v861_v52 = vand.u32 4294901760, %v860_v42  ;;  %v868_v55 = vand.u32 4294901760, %v867_v46 }
  0x4d   :  { %1766 = vmatpush3.bf16.msra.mxu0 %v1763_v4  ;;  %1556 = vmatprep.mubr.f32.mxu0 %v2150_v25  ;;  %v875_v59 = vand.u32 4294901760, %v874_v47  ;;  %v1783_v4 = vpack.c.bf16 %v213_v37, %v206_v36 }
  0x4e   :  { %1768 = vmatprep.subr.bf16.mxu0 %v1767_v13  ;;  %v1811_v53 = vpack.c.bf16 %v847_v45, %v840_v44  ;;  %v1815_v54 = vpack.c.bf16 %v861_v52, %v854_v48  ;;  %v1835_v44 = vpack.c.bf16 %v2248_v12, %v2243_v11  ;;  %v1410_v12 = vld [vmem:[%s2442_s3] ss:$0 sm:$0xff]  ;;  %s2015_s3 = scalar_lea.vmem %s1398_s29, 512 }
  0x4f   :  { %v1819_v60 = vpack.c.bf16 %v875_v59, %v868_v55  ;;  %p2016_p10 = scmp.ne.s32.totalorder %s1398_s29, %s2015_s3  ;;  %p2021_p12 = scmp.lt.s32.totalorder %s2015_s3, %s2015_s3 }
  0x50   :  { %1557 = vmatmul.mubr.f32.gmra.mrb[2].mxu0 %v2154_v27  ;;  %1812 = vmatprep.subr.bf16.mxu1 %v1811_v53 }
  0x51   :  { %1770 = vmatpush3.bf16.msra.mxu0 %v1767_v13  ;;  %1567 = vmatprep.mubr.f32.mxu0 %v2144_v22  ;;  %p2022_p13 = por %p2021_p12, %p2020_p11 }
  0x52   :  { %1772 = vmatprep.subr.bf16.mxu0 %v2128_v14  ;;  %1814 = vmatpush3.bf16.msra.mxu1 %v1811_v53 }
  0x53   :  { %1816 = vmatprep.subr.bf16.mxu1 %v1815_v54  ;;  %p2023_p0 = pnand %p2022_p13, %p2016_p10 }
  0x54   :  { %1568 = vmatmul.mubr.f32.vlgmr.msra.gmra.mrb[0].mxu0 %v2147_v23 }
  0x55   :  { %1774 = vmatpush3.bf16.msra.mxu0 %v2128_v14  ;;  %1570 = vmatprep.mubr.f32.mxu0 %v2167_v33 }
  0x56   :  { %1776 = vmatprep.subr.bf16.mxu0 %v2136_v18  ;;  %1818 = vmatpush3.bf16.msra.mxu1 %v1815_v54 }
  0x57   :  { %1820 = vmatprep.subr.bf16.mxu1 %v1819_v60 }
  0x58   :  { %1571 = vmatmul.mubr.f32.gmra.mrb[2].mxu0 %v2173_v35 }
  0x59   :  { %1778 = vmatpush3.bf16.msra.mxu0 %v2136_v18  ;;  %1581 = vmatprep.mubr.f32.mxu0 %v151_v30 }
  0x5a   :  { %1780 = vmatprep.subr.bf16.mxu0 %v1779_v61  ;;  %1822 = vmatpush3.bf16.msra.mxu1 %v1819_v60 }
  0x5c   :  { %1582 = vmatmul.mubr.f32.vlgmr.msra.gmra.mrb[0].mxu0 %v161_v31 }
  0x5d   :  { %1782 = vmatpush3.bf16.msra.mxu0 %v1779_v61  ;;  %1584 = vmatprep.mubr.f32.mxu0 %v171_v41  ;;  %v1859_v61 = vpack.c.bf16 %v845_v10, %v838_v9 }
  0x5e   :  { %1784 = vmatprep.subr.bf16.mxu0 %v1783_v4 }
  0x60   :  { %1585 = vmatmul.mubr.f32.gmra.mrb[2].mxu0 %v181_v43 }
  0x61   :  { %1786 = vmatpush3.bf16.msra.mxu0 %v1783_v4  ;;  %1595 = vmatprep.mubr.f32.mxu0 %v2130_v15  ;;  %v1863_v4 = vpack.c.bf16 %v859_v21, %v852_v20 }
  0x62   :  { %1788 = vmatprep.subr.bf16.mxu0 %v2128_v14 }
  0x64   :  { %1596 = vmatmul.mubr.f32.vlgmr.msra.gmra.mrb[0].mxu0 %v2132_v16 }
  0x65   :  { %1790 = vmatpush3.bf16.msra.mxu0 %v2128_v14  ;;  %1598 = vmatprep.mubr.f32.mxu0 %v2150_v25  ;;  %v2321_v14 = vpack.c.bf16 %v732_v1, %v729_v0 }
  0x66   :  { %1792 = vmatprep.subr.bf16.mxu0 %v2136_v18 }
  0x68   :  { %1599 = vmatmul.mubr.f32.gmra.mrb[2].mxu0 %v2154_v27 }
  0x69   :  { %1794 = vmatpush3.bf16.msra.mxu0 %v2136_v18  ;;  %1609 = vmatprep.mubr.f32.mxu0 %v2130_v15  ;;  %v2331_v18 = vpack.c.bf16 %v738_v3, %v735_v2  ;;  %v700_v15 = vld [vmem:[#allocation7 + $0x30] sm:$0xff] }
  0x6a   :  { %1796 = vmatprep.subr.bf16.mxu0 %v2312_v17  ;;  %v741_v19 = vand.u32 4294901760, %v700_v15 }
  0x6c   :  { %1610 = vmatmul.mubr.f32.vlgmr.msra.gmra.mrb[0].mxu0 %v2132_v16  ;;  %v701_v16 = vld [vmem:[#allocation7 + $0x38] sm:$0xff]  ;;  %v879_v23 = vsub.f32 %v700_v15, %v741_v19 }
  0x6d   :  { %1612 = vmatprep.mubr.f32.mxu0 %v2150_v25  ;;  %1798 = vmatpush3.bf16.msra.mxu0 %v2312_v17  ;;  %v744_v22 = vand.u32 4294901760, %v701_v16 }
  0x6e   :  { %1800 = vmatprep.subr.bf16.mxu0 %v2321_v14  ;;  %v880_v25 = vand.u32 4294901760, %v879_v23 }
  0x6f   :  { %v886_v24 = vsub.f32 %v701_v16, %v744_v22  ;;  %v2340_v35 = vpack.c.bf16 %v744_v22, %v741_v19 }
  0x70   :  { %1613 = vmatmul.mubr.f32.gmra.mrb[2].mxu0 %v2154_v27  ;;  %v881_v28 = vsub.f32 %v879_v23, %v880_v25  ;;  %v1827_v27 = vpack.c.bf16 %v2226_v6, %v2221_v5  ;;  %v1867_v5 = vpack.c.bf16 %v873_v39, %v866_v38 }
  0x71   :  { %1802 = vmatpush3.bf16.msra.mxu0 %v2321_v14  ;;  %v887_v26 = vand.u32 4294901760, %v886_v24  ;;  %v1839_v36 = vpack.c.bf16 %v886_v24, %v879_v23 }
  0x72   :  { %1804 = vmatprep.subr.bf16.mxu0 %v2331_v18  ;;  %v882_v30 = vand.u32 4294901760, %v881_v28 }
  0x73   :  { %v888_v29 = vsub.f32 %v886_v24, %v887_v26  ;;  %v2345_v37 = vpack.c.bf16 %v887_v26, %v880_v25 }
  0x75   :  { %1806 = vmatpush3.bf16.msra.mxu0 %v2331_v18  ;;  %v889_v31 = vand.u32 4294901760, %v888_v29 }
  0x76   :  { %1808 = vmatprep.subr.bf16.mxu0 %v2340_v35 }
  0x77   :  { %v1823_v33 = vpack.c.bf16 %v889_v31, %v882_v30 }
  0x79   :  { %1824 = vmatprep.subr.bf16.mxu1 %v1823_v33  ;;  %1810 = vmatpush3.bf16.msra.mxu0 %v2340_v35 }
  0x7a   :  { %1826 = vmatpush3.bf16.msra.mxu1 %v1823_v33  ;;  %1876 = vmatprep.subr.bf16.mxu0 %v2312_v17 }
  0x7b   :  { %1828 = vmatprep.subr.bf16.mxu1 %v1827_v27 }
 0x13f   :  { %v1611_v41 = vpop.f32.mrb[0].mxu0 }
 0x140   :  { %v714_v43 = vsel %vm709_vm1, %v1611_v41, 0  ;;  %v672_v49 = vpop.f32.mrb[1].mxu0 }
 0x141   :  { %v2348_v50 = vand.u32 4294901760, %v714_v43  ;;  %v711_v51 = vsel %vm709_vm1, %v672_v49, 0 }
 0x142   :  { %v2351_v56 = vand.u32 4294901760, %v711_v51 }
 0x143   :  { %v2354_v57 = vsub.f32 %v714_v43, %v2348_v50  ;;  %v1614_v58 = vpop.f32.mrb[2].mxu0 }
 0x144   :  { %v796_v63 = vsub.f32 %v711_v51, %v2351_v56  ;;  %v720_v0 = vsel %vm709_vm1, %v1614_v58, 0  ;;  %v684_v1 = vpop.f32.mrb[3].mxu0  ;;  %1653 = vmatprep.mubr.f32.mxu1 %v2351_v56 }
 0x145   :  { %v807_v2 = vand.u32 4294901760, %v2354_v57  ;;  %v2362_v3 = vand.u32 4294901760, %v720_v0  ;;  %v717_v13 = vsel %vm709_vm1, %v684_v1, 0  ;;  %1654 = vmatmul.mubr.f32.vlgmr.msra.gmra.mrb[0].mxu1 %v2348_v50 }
 0x146   :  { %v797_v32 = vand.u32 4294901760, %v796_v63  ;;  %v2366_v34 = vand.u32 4294901760, %v717_v13  ;;  %1830 = vmatpush3.bf16.msra.mxu1 %v1827_v27 }
 0x147   :  { %v808_v40 = vsub.f32 %v2354_v57, %v807_v2  ;;  %v826_v42 = vsub.f32 %v720_v0, %v2362_v3  ;;  %1832 = vmatprep.subr.bf16.mxu1 %v1831_v62 }
 0x148   :  { %v816_v45 = vsub.f32 %v717_v13, %v2366_v34  ;;  %1656 = vmatprep.mubr.f32.mxu1 %v2366_v34  ;;  %v798_v46 = vsub.f32 %v796_v63, %v797_v32 }
 0x149   :  { %v827_v47 = vand.u32 4294901760, %v826_v42  ;;  %1657 = vmatmul.mubr.f32.gmra.mrb[2].mxu1 %v2362_v3  ;;  %v809_v53 = vand.u32 4294901760, %v808_v40 }
 0x14a   :  { %v817_v48 = vand.u32 4294901760, %v816_v45  ;;  %1834 = vmatpush3.bf16.msra.mxu1 %v1831_v62  ;;  %1675 = vmatprep.mubr.f32.mxu1 %v796_v63  ;;  %v799_v52 = vand.u32 4294901760, %v798_v46 }
 0x14b   :  { %1836 = vmatprep.subr.bf16.mxu1 %v1835_v44  ;;  %v828_v54 = vsub.f32 %v826_v42, %v827_v47 }
 0x14c   :  { %1631 = vmatprep.mubr.f32.mxu0 %v799_v52  ;;  %v818_v55 = vsub.f32 %v816_v45, %v817_v48 }
 0x14d   :  { %1632 = vmatmul.mubr.f32.vlgmr.msra.gmra.mrb[4].mxu0 %v809_v53  ;;  %v829_v60 = vand.u32 4294901760, %v828_v54 }
 0x14e   :  { %1838 = vmatpush3.bf16.msra.mxu1 %v1835_v44  ;;  %1878 = vmatpush3.bf16.msra.mxu0 %v2312_v17  ;;  %v819_v59 = vand.u32 4294901760, %v818_v55 }
 0x14f   :  { %1840 = vmatprep.subr.bf16.mxu1 %v1839_v36  ;;  %1880 = vmatprep.subr.bf16.mxu0 %v2321_v14 }
 0x150   :  { %1634 = vmatprep.mubr.f32.mxu0 %v819_v59 }
 0x151   :  { %1635 = vmatmul.mubr.f32.gmra.mrb[6].mxu0 %v829_v60 }
 0x152   :  { %1842 = vmatpush3.bf16.msra.mxu1 %v1839_v36  ;;  %1882 = vmatpush3.bf16.msra.mxu0 %v2321_v14 }
 0x153   :  { %1741 = vmatprep.mubr.f32.mxu0 %v2351_v56  ;;  %1844 = vmatprep.subr.bf16.mxu1 %v2312_v17 }
 0x154   :  { %1884 = vmatprep.subr.bf16.mxu0 %v2331_v18 }
 0x155   :  { %1676 = vmatmul.mubr.f32.vlgmr.msra.gmra.mrb[0].mxu1 %v2354_v57 }
 0x156   :  { %1678 = vmatprep.mubr.f32.mxu1 %v816_v45  ;;  %1846 = vmatpush3.bf16.msra.mxu1 %v2312_v17 }
 0x157   :  { %1886 = vmatpush3.bf16.msra.mxu0 %v2331_v18  ;;  %1848 = vmatprep.subr.bf16.mxu1 %v2321_v14 }
 0x158   :  { %1888 = vmatprep.subr.bf16.mxu0 %v2340_v35 }
 0x159   :  { %1679 = vmatmul.mubr.f32.gmra.mrb[2].mxu1 %v826_v42 }
 0x15a   :  { %1850 = vmatpush3.bf16.msra.mxu1 %v2321_v14  ;;  %1697 = vmatprep.mubr.f32.mxu1 %v797_v32 }
 0x15b   :  { %1890 = vmatpush3.bf16.msra.mxu0 %v2340_v35  ;;  %1852 = vmatprep.subr.bf16.mxu1 %v2331_v18 }
 0x15e   :  { %1742 = vmatmul.mubr.f32.vlgmr.msra.gmra.mrb[8].mxu0 %v2348_v50  ;;  %1854 = vmatpush3.bf16.msra.mxu1 %v2331_v18 }
 0x15f   :  { %1856 = vmatprep.subr.bf16.mxu1 %v2340_v35 }
 0x162   :  { %1858 = vmatpush3.bf16.msra.mxu1 %v2340_v35 }
 0x163   :  { %1860 = vmatprep.subr.bf16.mxu1 %v1859_v61 }
 0x165   :  { %1698 = vmatmul.mubr.f32.vlgmr.msra.gmra.mrb[0].mxu1 %v807_v2 }
 0x166   :  { %1700 = vmatprep.mubr.f32.mxu1 %v817_v48  ;;  %1862 = vmatpush3.bf16.msra.mxu1 %v1859_v61 }
 0x167   :  { %1864 = vmatprep.subr.bf16.mxu1 %v1863_v4 }
 0x169   :  { %1701 = vmatmul.mubr.f32.gmra.mrb[2].mxu1 %v827_v47 }
 0x16a   :  { %1866 = vmatpush3.bf16.msra.mxu1 %v1863_v4  ;;  %1719 = vmatprep.mubr.f32.mxu1 %v2351_v56 }
 0x16b   :  { %1868 = vmatprep.subr.bf16.mxu1 %v1867_v5 }
 0x16e   :  { %1870 = vmatpush3.bf16.msra.mxu1 %v1867_v5 }
 0x16f   :  { %1872 = vmatprep.subr.bf16.mxu1 %v2345_v37 }
 0x172   :  { %1874 = vmatpush3.bf16.msra.mxu1 %v2345_v37 }
 0x173   :  { %1891 = vmatprep.subr.bf16.mxu1 %v2312_v17 }
 0x175   :  { %1720 = vmatmul.mubr.f32.vlgmr.msra.gmra.mrb[0].mxu1 %v2348_v50 }
 0x176   :  { %1722 = vmatprep.mubr.f32.mxu1 %v2366_v34  ;;  %1895 = vmatpush3.bf16.msra.mxu1 %v2312_v17 }
 0x177   :  { %1892 = vmatprep.subr.bf16.mxu1 %v2321_v14 }
 0x179   :  { %1723 = vmatmul.mubr.f32.gmra.mrb[2].mxu1 %v2362_v3 }
 0x17a   :  { %1896 = vmatpush3.bf16.msra.mxu1 %v2321_v14  ;;  %1744 = vmatprep.mubr.f32.mxu1 %v2366_v34 }
 0x17b   :  { %1893 = vmatprep.subr.bf16.mxu1 %v2331_v18 }
 0x17e   :  { %1897 = vmatpush3.bf16.msra.mxu1 %v2331_v18 }
 0x17f   :  { %1894 = vmatprep.subr.bf16.mxu1 %v2340_v35 }
 0x182   :  { %1898 = vmatpush3.bf16.msra.mxu1 %v2340_v35 }
 0x185   :  { %1745 = vmatmul.mubr.f32.vlgmr.msra.gmra.mrb[2].mxu1 %v2362_v3 }
 0x220   :  { %v1633_v6 = vpop.f32.mrb[4].mxu0 }
 0x221   :  { %v801_v7 = vpop.f32.mrb[5].mxu0  ;;  %v812_v20 = vadd.f32 %v1633_v6, %v1410_v12 }
 0x222   :  { %v802_v21 = vadd.f32 %v1410_v12, %v801_v7 }
 0x224   :  { %v1636_v8 = vpop.f32.mrb[6].mxu0 }
 0x225   :  { %v821_v9 = vpop.f32.mrb[7].mxu0  ;;  %v832_v16 = vadd.f32 %v1636_v8, %v1410_v12 }
 0x226   :  { %v822_v19 = vadd.f32 %v1410_v12, %v821_v9 }
 0x231   :  { %v1743_v10 = vpop.f32.mrb[8].mxu0 }
 0x232   :  { %v1366_v11 = vpop.f32.mrb[9].mxu0 }
 0x248   :  { %v1721_v38 = vpop.f32.mrb[0].mxu1 }
 0x249   :  { %v1900_v39 = vadd.f32 %v1721_v38, %v812_v20  ;;  %v1269_v17 = vpop.f32.mrb[1].mxu1 }
 0x24a   :  { %v1903_v14 = vadd.f32 %v1269_v17, %v802_v21 }
 0x24b   :  { %v1901_v18 = vadd.f32 %v1900_v39, %v1743_v10 }
 0x24c   :  { %v1904_v15 = vadd.f32 %v1903_v14, %v1366_v11 }
 0x24d   :  { %1389 = vst [vmem:[#allocation8 + $0x8] sm:$0xff] %v1901_v18 }
 0x24e   :  { %1388 = vst [vmem:[#allocation8] sm:$0xff] %v1904_v15 }
 0x258   :  { %v1746_v22 = vpop.f32.mrb[2].mxu1 }
 0x259   :  { %v1906_v23 = vadd.f32 %v1746_v22, %v832_v16  ;;  %v1378_v24 = vpop.f32.mrb[3].mxu1 }
 0x25a   :  { %v1908_v25 = vadd.f32 %v1378_v24, %v822_v19 }
 0x25b   :  { %1391 = vst [vmem:[#allocation8 + $0x18] sm:$0xff] %v1906_v23 }
 0x25c   :  { %1390 = vst [vmem:[#allocation8 + $0x10] sm:$0xff] %v1908_v25 }
 0x25d   :  { %2026 = shalt.err (!%p2023_p0)
}
 0x25e   :  { %s2027_s6 = scalar_lea.hbm %s2443_s4, 512 }
 0x25f   :  { %p2028_p1 = scmp.ne.s32.totalorder %s2443_s4, %s2027_s6  ;;  %p2031_p2 = scmp.lt.u32.totalorder %s2027_s6, %s2443_s4 }
 0x261   :  { %p2033_p3 = pnand %p2031_p2, %p2028_p1 }
 0x263   :  { %2036 = shalt.err (!%p2033_p3)
}
 0x264   :  { %1403 = dma.vmem_to_hbm [thread:$0]  %s1398_s29, 512, %s2443_s4, [#allocation4], %s2045_s27, %s2045_s27, %s2046_s28  }
 0x265   :  { %2041 = dma.done.wait [#allocation4], 512  }
 0x266   :  { %2042 = vsyncadd [#allocation4], 4294966784 }
 0x267   :  { %1407 = vsyncpa [#allocation3], 1 }
 0x268   :  { %1408 = vsyncpa [#allocation6], 1 }
 0x269   :  { %1409 = vsyncpa [#allocation4], 1 }

</bundles_post_ra>
